<compile_context>
chip_gen: v7x
topology: tpu7x:2x2x1
jax: 0.10.0
libtpu: 0.0.40
codegen_flags: <defaults>
</compile_context>

<pallas_src>
import functools

import numpy as np
import jax
import jax.numpy as jnp
from jax import lax
from jax.experimental import pallas as pl
from jax.experimental.pallas import tpu as pltpu


# ----------------------------------------------------------------------------
# Pallas kernel: per-(batch, branch) dynamic 3x3 conv as 9 accumulating taps
# ----------------------------------------------------------------------------
def _dyconv_kernel(x_ref, w_ref, o_ref, *, ksize, C, Wp, HoWp):
    """One grid step = one (batch, branch) image.

    x_ref : (1, C, FLAT)   zero-padded flat image, FLAT = Hp*Wp + ksize - 1
    w_ref : (1, O, KK*C)   folded per-image conv weight, column = tap*C + c
    o_ref : (1, O, HoWp)   flat NCHW output (columns with ox >= Wo are garbage)

    Flat-1D-conv trick: tap (kh, kw) of the padded image is the contiguous
    lane slice of x starting at kh*Wp + kw, so the whole conv is a sum of
    ksize*ksize small MXU matmuls over shifted slices -- no im2col patch
    matrix, no in-kernel padding copies.
    """
    acc = None
    for idx in range(ksize * ksize):          # 9 taps, statically unrolled
        kh, kw = divmod(idx, ksize)
        off = kh * Wp + kw
        rhs = x_ref[0, :, off:off + HoWp]            # (C, HoWp) shifted slice
        lhs = w_ref[0, :, idx * C:(idx + 1) * C]     # (O, C) tap weight
        part = jnp.dot(lhs, rhs, preferred_element_type=jnp.float32)
        acc = part if acc is None else acc + part
    o_ref[0] = acc.astype(o_ref.dtype)


def dynamic_conv_pallas(x_under, x_over, w_under, w_over, *, ksize, padding):
    """x_*: (B, C, H, W) NCHW; w_*: (B, O, ksize*ksize*C) folded weights.
    Returns (out_under, out_over), each (B, O, Ho, Wo).
    stride=1, dilation=1, groups=1 (module defaults)."""
    B, C, H, W = x_under.shape
    O = w_under.shape[1]
    KK = ksize * ksize
    Hp, Wp = H + 2 * padding, W + 2 * padding
    Ho, Wo = Hp - ksize + 1, Wp - ksize + 1
    HoWp = Ho * Wp
    FLAT = Hp * Wp + ksize - 1        # small tail so every tap slice is in-bounds

    # Zero-pad once in the wrapper (one cheap HBM pass over tiny arrays) and
    # fold the branch dimension into the batch/grid dimension.
    x_all = jnp.concatenate([x_under, x_over], axis=0)               # (2B,C,H,W)
    x_all = jnp.pad(x_all, ((0, 0), (0, 0),
                            (padding, padding), (padding, padding)))  # (2B,C,Hp,Wp)
    x_all = x_all.reshape(2 * B, C, Hp * Wp)
    x_all = jnp.pad(x_all, ((0, 0), (0, 0), (0, ksize - 1)))          # (2B,C,FLAT)
    w_all = jnp.concatenate([w_under, w_over], axis=0)                # (2B,O,KK*C)

    kernel = functools.partial(_dyconv_kernel, ksize=ksize, C=C, Wp=Wp,
                               HoWp=HoWp)

    out = pl.pallas_call(
        kernel,
        out_shape=jax.ShapeDtypeStruct((2 * B, O, HoWp), x_under.dtype),
        grid_spec=pltpu.PrefetchScalarGridSpec(
            num_scalar_prefetch=0,
            grid=(2 * B,),
            in_specs=[
                pl.BlockSpec((1, C, FLAT), lambda b: (b, 0, 0)),
                pl.BlockSpec((1, O, KK * C), lambda b: (b, 0, 0)),
            ],
            out_specs=pl.BlockSpec((1, O, HoWp), lambda b: (b, 0, 0)),
        ),
        compiler_params=pltpu.CompilerParams(
            dimension_semantics=("parallel",)),
    )(x_all, w_all)

    # Drop the Wp-Wo garbage columns produced by the flat-conv layout, split
    # the two branches back out.
    # TODO(synk): skip this crop if downstream consumers can read NCHW with Wp
    #             columns (it is an extra HBM pass at realistic sizes).
    out = out.reshape(2 * B, O, Ho, Wp)[:, :, :, :Wo]
    return out[:B], out[B:]


# ----------------------------------------------------------------------------
# Attention folding (tiny, plain-JAX glue)
# ----------------------------------------------------------------------------
def fold_dynamic_weight(chan, filt, spat, katt, shared, *, ksize):
    """Fold kernel/spatial/channel/filter attentions into a per-batch conv
    weight laid out to match the kernel's tap ordering.
    chan:(B,C) filt:(B,O) spat:(B,k*k) katt:(B,K) shared:(K,O,C,k,k)
    -> (B, O, k*k*C) with column index = (kh*ksize + kw)*C + c."""
    B = chan.shape[0]
    C = shared.shape[2]
    O = shared.shape[1]
    agg = jnp.einsum('bk,kochw->bochw', katt, shared)            # kernel att
    agg = agg * spat.reshape(B, 1, 1, ksize, ksize)              # spatial att
    agg = agg * chan.reshape(B, 1, C, 1, 1)                      # channel att (== scaling x)
    agg = agg * filt.reshape(B, O, 1, 1, 1)                      # filter att (== scaling out)
    w_t = jnp.transpose(agg, (0, 1, 3, 4, 2))                    # (B, O, kh, kw, C)
    return w_t.reshape(B, O, ksize * ksize * C).astype(jnp.float32)


def attention_branch(r_nchw, p, temperature):
    """r_nchw: (B, 2C, H, W).  Mirrors Mutual_Attention.forward exactly:
    avgpool -> fc (no bias) -> relu (bn is defined but NOT used in the PyTorch
    forward) -> four heads."""
    pooled = jnp.mean(r_nchw, axis=(2, 3))                              # (B, 2C)
    h = jnp.maximum(pooled @ p["fc_w"].T, 0.0)                          # (B, att_ch)
    chan = jax.nn.sigmoid((h @ p["ch_w"].T + p["ch_b"]) / temperature)  # (B, C)
    filt = jax.nn.sigmoid((h @ p["f_w"].T + p["f_b"]) / temperature)    # (B, O)
    spat = jax.nn.sigmoid((h @ p["s_w"].T + p["s_b"]) / temperature)    # (B, k*k)
    katt = jax.nn.softmax((h @ p["k_w"].T + p["k_b"]) / temperature,
                          axis=1)                                       # (B, K)
    return chan, filt, spat, katt


# ----------------------------------------------------------------------------
# Mutual_ODEncoder forward
# ----------------------------------------------------------------------------
def mutual_odencoder_forward(params, x_over, x_under, *, ksize=3, padding=1):
    T = params["temperature"]
    feat_under = x_under
    feat_over = x_over
    # TODO(synk): the reference `_forward_impl_common` references an undefined
    # `feat_ref` (and forward() never supplies x_ref).  We interpret
    # feat_ref := feat_over, consistent with forward(x_over, x_under).
    feat_ref = feat_over
    shared = params["shared_weight"]

    # ---- under branch attentions ----
    r1 = jnp.concatenate([feat_ref, feat_under], axis=1)
    ch1, f1, s1, k1 = attention_branch(r1, params["under_att"], T)
    w_under = fold_dynamic_weight(ch1, f1, s1, k1, shared, ksize=ksize)

    # ---- over branch attentions ----
    r3 = jnp.concatenate([feat_under, feat_over], axis=1)
    ch3, f3, s3, k3 = attention_branch(r3, params["over_att"], T)
    w_over = fold_dynamic_weight(ch3, f3, s3, k3, shared, ksize=ksize)

    # ---- single Pallas call covering both dynamic convs (branch = grid axis)
    out_under, out_over = dynamic_conv_pallas(
        x_under, x_over, w_under, w_over, ksize=ksize, padding=padding)
    return [out_under, out_over]


# ----------------------------------------------------------------------------
# Pure-JAX reference (mirrors the PyTorch op ordering) for correctness check
# ----------------------------------------------------------------------------
def _ref_dynconv(x, chan, filt, spat, katt, shared, *, ksize, padding):
    B, C, H, W = x.shape
    K, O = shared.shape[0], shared.shape[1]
    xs = x * chan.reshape(B, C, 1, 1)
    spat6 = spat.reshape(B, 1, 1, 1, ksize, ksize)
    katt6 = katt.reshape(B, K, 1, 1, 1, 1)
    agg = jnp.sum(spat6 * katt6 * shared[None], axis=1)          # (B,O,C,k,k)
    outs = []
    for b in range(B):
        o = lax.conv_general_dilated(
            xs[b:b + 1], agg[b], window_strides=(1, 1),
            padding=[(padding, padding), (padding, padding)],
            dimension_numbers=("NCHW", "OIHW", "NCHW"))
        outs.append(o)
    out = jnp.concatenate(outs, axis=0)
    return out * filt.reshape(B, O, 1, 1)


def reference_forward(params, x_over, x_under, *, ksize=3, padding=1):
    T = params["temperature"]
    feat_under, feat_over = x_under, x_over
    feat_ref = feat_over
    r1 = jnp.concatenate([feat_ref, feat_under], axis=1)
    ch1, f1, s1, k1 = attention_branch(r1, params["under_att"], T)
    ou = _ref_dynconv(x_under, ch1, f1, s1, k1, params["shared_weight"],
                      ksize=ksize, padding=padding)
    r3 = jnp.concatenate([feat_under, feat_over], axis=1)
    ch3, f3, s3, k3 = attention_branch(r3, params["over_att"], T)
    oo = _ref_dynconv(x_over, ch3, f3, s3, k3, params["shared_weight"],
                      ksize=ksize, padding=padding)
    return [ou, oo]


# ----------------------------------------------------------------------------
# Deterministic parameter init (shapes follow Mutual_Attention.__init__)
# ----------------------------------------------------------------------------
def init_attention_params(key, in_att, out_planes, ksize, kernel_num):
    att_ch = max(int(in_att * 0.0625), 16)
    in_half = in_att // 2
    ks = jax.random.split(key, 5)

    def kaiming(k, shape, fan_out):
        return jax.random.normal(k, shape, jnp.float32) * np.sqrt(2.0 / fan_out)

    return dict(
        fc_w=kaiming(ks[0], (att_ch, in_att), att_ch),               # fc (no bias)
        ch_w=kaiming(ks[1], (in_half, att_ch), in_half),             # channel_fc
        ch_b=jnp.zeros((in_half,), jnp.float32),
        f_w=kaiming(ks[2], (out_planes, att_ch), out_planes),        # filter_fc
        f_b=jnp.zeros((out_planes,), jnp.float32),
        s_w=kaiming(ks[3], (ksize * ksize, att_ch), ksize * ksize),  # spatial_fc
        s_b=jnp.zeros((ksize * ksize,), jnp.float32),
        k_w=kaiming(ks[4], (kernel_num, att_ch), kernel_num),        # kernel_fc
        k_b=jnp.zeros((kernel_num,), jnp.float32),
    )


def init_params(key, in_planes, out_planes, ksize, kernel_num, inference=False):
    k1, k2, k3, _k_ref = jax.random.split(key, 4)
    temperature = 1.0 if inference else 34.0
    shared = (jax.random.normal(k3, (kernel_num, out_planes, in_planes,
                                     ksize, ksize), jnp.float32)
              * np.sqrt(2.0 / (out_planes * ksize * ksize)))
    # Note: ref_attention is constructed in the PyTorch module but never used
    # in forward(), so it is omitted here.
    return dict(
        temperature=temperature,
        under_att=init_attention_params(k1, 2 * in_planes, out_planes,
                                        ksize, kernel_num),
        over_att=init_attention_params(k2, 2 * in_planes, out_planes,
                                       ksize, kernel_num),
        shared_weight=shared,
    )


# ----------------------------------------------------------------------------
if __name__ == "__main__":
    B, C, H, W = 2, 4, 16, 16        # batch, in_planes, spatial
    O, KSIZE, KNUM = 8, 3, 4         # out_planes, kernel_size, kernel_num

    key = jax.random.PRNGKey(0)
    kp, kx1, kx2 = jax.random.split(key, 3)
    params = init_params(kp, C, O, KSIZE, KNUM, inference=False)

    x_over = jax.random.normal(kx1, (B, C, H, W), jnp.float32)
    x_under = jax.random.normal(kx2, (B, C, H, W), jnp.float32)

    out_under, out_over = mutual_odencoder_forward(params, x_over, x_under,
                                                   ksize=KSIZE, padding=1)
    jax.block_until_ready((out_under, out_over))

    ref_under, ref_over = reference_forward(params, x_over, x_under,
                                            ksize=KSIZE, padding=1)
    jax.block_until_ready((ref_under, ref_over))

    assert out_under.shape == (B, O, H, W)
    assert out_over.shape == (B, O, H, W)
    np.testing.assert_allclose(np.asarray(out_under), np.asarray(ref_under),
                               rtol=1e-4, atol=1e-4)
    np.testing.assert_allclose(np.asarray(out_over), np.asarray(ref_over),
                               rtol=1e-4, atol=1e-4)
    print("KERNEL_OK")
</pallas_src>

<mosaic_0001>
module attributes {stable_mosaic.version = 11 : i64} {
  func.func @_dyconv_kernel(%arg0: i32, %arg1: memref<1x4x326xf32, #tpu.memory_space<vmem>>, %arg2: memref<1x8x36xf32, #tpu.memory_space<vmem>>, %arg3: memref<1x8x288xf32, #tpu.memory_space<vmem>>) attributes {dimension_semantics = [#tpu.dimension_semantics<parallel>], iteration_bounds = array<i64: 4>, scalar_prefetch = 0 : i64, scratch_operands = 0 : i64, tpu.core_type = #tpu.core_type<tc>, window_params = [{transform_indices = @transform_0, window_bounds = array<i64: 1, 4, 326>}, {transform_indices = @transform_1, window_bounds = array<i64: 1, 8, 36>}, {transform_indices = @transform_2, window_bounds = array<i64: 1, 8, 288>}]} {
    %c0 = arith.constant 0 : index
    %c0_0 = arith.constant 0 : index
    %c0_1 = arith.constant 0 : index
    %0 = vector.load %arg1[%c0, %c0_0, %c0_1] : memref<1x4x326xf32, #tpu.memory_space<vmem>>, vector<1x4x288xf32>
    %1 = vector.shape_cast %0 : vector<1x4x288xf32> to vector<4x288xf32>
    %c0_2 = arith.constant 0 : index
    %c0_3 = arith.constant 0 : index
    %c0_4 = arith.constant 0 : index
    %2 = vector.load %arg2[%c0_2, %c0_3, %c0_4] : memref<1x8x36xf32, #tpu.memory_space<vmem>>, vector<1x8x4xf32>
    %3 = vector.shape_cast %2 : vector<1x8x4xf32> to vector<8x4xf32>
    %cst = arith.constant dense<0.000000e+00> : vector<8x288xf32>
    %4 = tpu.matmul %3, %1, %cst {dimension_numbers = #tpu.dot_dimension_numbers<[1], [0], [0], [1], [0, 0, 1, 1], [], []>} : vector<8x4xf32>, vector<4x288xf32>, vector<8x288xf32> -> vector<8x288xf32>
    %c0_5 = arith.constant 0 : index
    %c0_6 = arith.constant 0 : index
    %c1 = arith.constant 1 : index
    %5 = vector.load %arg1[%c0_5, %c0_6, %c1] : memref<1x4x326xf32, #tpu.memory_space<vmem>>, vector<1x4x288xf32>
    %6 = vector.shape_cast %5 : vector<1x4x288xf32> to vector<4x288xf32>
    %c0_7 = arith.constant 0 : index
    %c0_8 = arith.constant 0 : index
    %c4 = arith.constant 4 : index
    %7 = vector.load %arg2[%c0_7, %c0_8, %c4] : memref<1x8x36xf32, #tpu.memory_space<vmem>>, vector<1x8x4xf32>
    %8 = vector.shape_cast %7 : vector<1x8x4xf32> to vector<8x4xf32>
    %cst_9 = arith.constant dense<0.000000e+00> : vector<8x288xf32>
    %9 = tpu.matmul %8, %6, %cst_9 {dimension_numbers = #tpu.dot_dimension_numbers<[1], [0], [0], [1], [0, 0, 1, 1], [], []>} : vector<8x4xf32>, vector<4x288xf32>, vector<8x288xf32> -> vector<8x288xf32>
    %10 = arith.addf %4, %9 : vector<8x288xf32>
    %c0_10 = arith.constant 0 : index
    %c0_11 = arith.constant 0 : index
    %c2 = arith.constant 2 : index
    %11 = vector.load %arg1[%c0_10, %c0_11, %c2] : memref<1x4x326xf32, #tpu.memory_space<vmem>>, vector<1x4x288xf32>
    %12 = vector.shape_cast %11 : vector<1x4x288xf32> to vector<4x288xf32>
    %c0_12 = arith.constant 0 : index
    %c0_13 = arith.constant 0 : index
    %c8 = arith.constant 8 : index
    %13 = vector.load %arg2[%c0_12, %c0_13, %c8] : memref<1x8x36xf32, #tpu.memory_space<vmem>>, vector<1x8x4xf32>
    %14 = vector.shape_cast %13 : vector<1x8x4xf32> to vector<8x4xf32>
    %cst_14 = arith.constant dense<0.000000e+00> : vector<8x288xf32>
    %15 = tpu.matmul %14, %12, %cst_14 {dimension_numbers = #tpu.dot_dimension_numbers<[1], [0], [0], [1], [0, 0, 1, 1], [], []>} : vector<8x4xf32>, vector<4x288xf32>, vector<8x288xf32> -> vector<8x288xf32>
    %16 = arith.addf %10, %15 : vector<8x288xf32>
    %c0_15 = arith.constant 0 : index
    %c0_16 = arith.constant 0 : index
    %c18 = arith.constant 18 : index
    %17 = vector.load %arg1[%c0_15, %c0_16, %c18] : memref<1x4x326xf32, #tpu.memory_space<vmem>>, vector<1x4x288xf32>
    %18 = vector.shape_cast %17 : vector<1x4x288xf32> to vector<4x288xf32>
    %c0_17 = arith.constant 0 : index
    %c0_18 = arith.constant 0 : index
    %c12 = arith.constant 12 : index
    %19 = vector.load %arg2[%c0_17, %c0_18, %c12] : memref<1x8x36xf32, #tpu.memory_space<vmem>>, vector<1x8x4xf32>
    %20 = vector.shape_cast %19 : vector<1x8x4xf32> to vector<8x4xf32>
    %cst_19 = arith.constant dense<0.000000e+00> : vector<8x288xf32>
    %21 = tpu.matmul %20, %18, %cst_19 {dimension_numbers = #tpu.dot_dimension_numbers<[1], [0], [0], [1], [0, 0, 1, 1], [], []>} : vector<8x4xf32>, vector<4x288xf32>, vector<8x288xf32> -> vector<8x288xf32>
    %22 = arith.addf %16, %21 : vector<8x288xf32>
    %c0_20 = arith.constant 0 : index
    %c0_21 = arith.constant 0 : index
    %c19 = arith.constant 19 : index
    %23 = vector.load %arg1[%c0_20, %c0_21, %c19] : memref<1x4x326xf32, #tpu.memory_space<vmem>>, vector<1x4x288xf32>
    %24 = vector.shape_cast %23 : vector<1x4x288xf32> to vector<4x288xf32>
    %c0_22 = arith.constant 0 : index
    %c0_23 = arith.constant 0 : index
    %c16 = arith.constant 16 : index
    %25 = vector.load %arg2[%c0_22, %c0_23, %c16] : memref<1x8x36xf32, #tpu.memory_space<vmem>>, vector<1x8x4xf32>
    %26 = vector.shape_cast %25 : vector<1x8x4xf32> to vector<8x4xf32>
    %cst_24 = arith.constant dense<0.000000e+00> : vector<8x288xf32>
    %27 = tpu.matmul %26, %24, %cst_24 {dimension_numbers = #tpu.dot_dimension_numbers<[1], [0], [0], [1], [0, 0, 1, 1], [], []>} : vector<8x4xf32>, vector<4x288xf32>, vector<8x288xf32> -> vector<8x288xf32>
    %28 = arith.addf %22, %27 : vector<8x288xf32>
    %c0_25 = arith.constant 0 : index
    %c0_26 = arith.constant 0 : index
    %c20 = arith.constant 20 : index
    %29 = vector.load %arg1[%c0_25, %c0_26, %c20] : memref<1x4x326xf32, #tpu.memory_space<vmem>>, vector<1x4x288xf32>
    %30 = vector.shape_cast %29 : vector<1x4x288xf32> to vector<4x288xf32>
    %c0_27 = arith.constant 0 : index
    %c0_28 = arith.constant 0 : index
    %c20_29 = arith.constant 20 : index
    %31 = vector.load %arg2[%c0_27, %c0_28, %c20_29] : memref<1x8x36xf32, #tpu.memory_space<vmem>>, vector<1x8x4xf32>
    %32 = vector.shape_cast %31 : vector<1x8x4xf32> to vector<8x4xf32>
    %cst_30 = arith.constant dense<0.000000e+00> : vector<8x288xf32>
    %33 = tpu.matmul %32, %30, %cst_30 {dimension_numbers = #tpu.dot_dimension_numbers<[1], [0], [0], [1], [0, 0, 1, 1], [], []>} : vector<8x4xf32>, vector<4x288xf32>, vector<8x288xf32> -> vector<8x288xf32>
    %34 = arith.addf %28, %33 : vector<8x288xf32>
    %c0_31 = arith.constant 0 : index
    %c0_32 = arith.constant 0 : index
    %c36 = arith.constant 36 : index
    %35 = vector.load %arg1[%c0_31, %c0_32, %c36] : memref<1x4x326xf32, #tpu.memory_space<vmem>>, vector<1x4x288xf32>
    %36 = vector.shape_cast %35 : vector<1x4x288xf32> to vector<4x288xf32>
    %c0_33 = arith.constant 0 : index
    %c0_34 = arith.constant 0 : index
    %c24 = arith.constant 24 : index
    %37 = vector.load %arg2[%c0_33, %c0_34, %c24] : memref<1x8x36xf32, #tpu.memory_space<vmem>>, vector<1x8x4xf32>
    %38 = vector.shape_cast %37 : vector<1x8x4xf32> to vector<8x4xf32>
    %cst_35 = arith.constant dense<0.000000e+00> : vector<8x288xf32>
    %39 = tpu.matmul %38, %36, %cst_35 {dimension_numbers = #tpu.dot_dimension_numbers<[1], [0], [0], [1], [0, 0, 1, 1], [], []>} : vector<8x4xf32>, vector<4x288xf32>, vector<8x288xf32> -> vector<8x288xf32>
    %40 = arith.addf %34, %39 : vector<8x288xf32>
    %c0_36 = arith.constant 0 : index
    %c0_37 = arith.constant 0 : index
    %c37 = arith.constant 37 : index
    %41 = vector.load %arg1[%c0_36, %c0_37, %c37] : memref<1x4x326xf32, #tpu.memory_space<vmem>>, vector<1x4x288xf32>
    %42 = vector.shape_cast %41 : vector<1x4x288xf32> to vector<4x288xf32>
    %c0_38 = arith.constant 0 : index
    %c0_39 = arith.constant 0 : index
    %c28 = arith.constant 28 : index
    %43 = vector.load %arg2[%c0_38, %c0_39, %c28] : memref<1x8x36xf32, #tpu.memory_space<vmem>>, vector<1x8x4xf32>
    %44 = vector.shape_cast %43 : vector<1x8x4xf32> to vector<8x4xf32>
    %cst_40 = arith.constant dense<0.000000e+00> : vector<8x288xf32>
    %45 = tpu.matmul %44, %42, %cst_40 {dimension_numbers = #tpu.dot_dimension_numbers<[1], [0], [0], [1], [0, 0, 1, 1], [], []>} : vector<8x4xf32>, vector<4x288xf32>, vector<8x288xf32> -> vector<8x288xf32>
    %46 = arith.addf %40, %45 : vector<8x288xf32>
    %c0_41 = arith.constant 0 : index
    %c0_42 = arith.constant 0 : index
    %c38 = arith.constant 38 : index
    %47 = vector.load %arg1[%c0_41, %c0_42, %c38] : memref<1x4x326xf32, #tpu.memory_space<vmem>>, vector<1x4x288xf32>
    %48 = vector.shape_cast %47 : vector<1x4x288xf32> to vector<4x288xf32>
    %c0_43 = arith.constant 0 : index
    %c0_44 = arith.constant 0 : index
    %c32 = arith.constant 32 : index
    %49 = vector.load %arg2[%c0_43, %c0_44, %c32] : memref<1x8x36xf32, #tpu.memory_space<vmem>>, vector<1x8x4xf32>
    %50 = vector.shape_cast %49 : vector<1x8x4xf32> to vector<8x4xf32>
    %cst_45 = arith.constant dense<0.000000e+00> : vector<8x288xf32>
    %51 = tpu.matmul %50, %48, %cst_45 {dimension_numbers = #tpu.dot_dimension_numbers<[1], [0], [0], [1], [0, 0, 1, 1], [], []>} : vector<8x4xf32>, vector<4x288xf32>, vector<8x288xf32> -> vector<8x288xf32>
    %52 = arith.addf %46, %51 : vector<8x288xf32>
    %c0_46 = arith.constant 0 : index
    %c0_47 = arith.constant 0 : index
    %c0_48 = arith.constant 0 : index
    %53 = vector.load %arg3[%c0_46, %c0_47, %c0_48] : memref<1x8x288xf32, #tpu.memory_space<vmem>>, vector<1x8x288xf32>
    %54 = vector.shape_cast %53 : vector<1x8x288xf32> to vector<8x288xf32>
    %55 = vector.shape_cast %52 : vector<8x288xf32> to vector<1x8x288xf32>
    tpu.vector_store %arg3[%c0_46, %c0_47, %c0_48], %55 {strides = array<i32>} : memref<1x8x288xf32, #tpu.memory_space<vmem>>, vector<1x8x288xf32>,
    return
  }
  func.func @transform_0(%arg0: i32) -> (i32, i32, i32) {
    %c0_i32 = arith.constant 0 : i32
    %c0_i32_0 = arith.constant 0 : i32
    %c0_i32_1 = arith.constant 0 : i32
    return %arg0, %c0_i32, %c0_i32_0 : i32, i32, i32
  }
  func.func @transform_1(%arg0: i32) -> (i32, i32, i32) {
    %c0_i32 = arith.constant 0 : i32
    %c0_i32_0 = arith.constant 0 : i32
    %c0_i32_1 = arith.constant 0 : i32
    return %arg0, %c0_i32, %c0_i32_0 : i32, i32, i32
  }
  func.func @transform_2(%arg0: i32) -> (i32, i32, i32) {
    %c0_i32 = arith.constant 0 : i32
    %c0_i32_0 = arith.constant 0 : i32
    %c0_i32_1 = arith.constant 0 : i32
    return %arg0, %c0_i32, %c0_i32_0 : i32, i32, i32
  }
}

</mosaic_0001>

<bundles_post_ra>
// kernel: tpu_custom_call.1
= control target key start
LH: loop header
LB: loop body
LE: loop exit
PB: predicated region body
PF: predicated region fallthrough
CT: control target
= control target key end

     0   :  { %7 = vsyncpa [#allocation3], 0  ;;  %s2540_s0 = inlined_call_operand.hbm [shape: f32[4,4,326], index: 0, kind: input, shape index: {}]   ;;  %s2541_s1 = inlined_call_operand.hbm [shape: f32[4,8,36], index: 1, kind: input, shape index: {}]   ;;  %s2542_s2 = inlined_call_operand.hbm [shape: f32[4,8,288], index: 2, kind: output, shape index: {}]  }
   0x1   :  { %9 = vsyncpa [#allocation3 + $0x1], 0 }
   0x2   :  { %10 = vsyncpa [#allocation6], 0 }
   0x3   :  { %12 = vsyncpa [#allocation6 + $0x1], 0 }
   0x4   :  { %13 = vsyncpa [#allocation4], 0 }
   0x5   :  { %15 = vsyncpa [#allocation4 + $0x1], 0  ;;  %s2209_s9 = smov 0   ;;  %s2211_s10 = smov 0  }
   0x6   :  { %s2213_s11 = smov 0   ;;  %s2215_s12 = smov 0  }
   0x7 LB: > { %s2230_s13 = sadd.s32 4294967295, %s2172_s12   ;;  %s1817_s14 = sadd.s32 4294967294, %s2172_s12   ;;  %s2172_s12 = sphi %s2215_s12, %s2559_s12   ;;  %s2168_s11 = sphi %s2213_s11, %s2558_s11   ;;  %s2164_s10 = sphi %s2211_s10, %s2557_s10   ;;  %s2160_s9 = sphi %s2209_s9, %s2556_s9  }
   0x8   : > { %s2234_s15 = sadd.s32 1, %s2172_s12   ;;  %s28_s16 = sadd.s32 1, %s2168_s11 }
   0x9   : > { %s25_s17 = ssub.s32 %s2172_s12, %s2234_s15  ;;  %p35_p0 = scmp.ne.s32.totalorder %s2168_s11, %s2164_s10 }
   0xa   : > { %p26_p1 = scmp.eq.s32.totalorder %s25_s17, 0  ;;  %p36_p2 = scmp.eq.s32.totalorder %s2172_s12, 0 }
   0xb   : > { %p41_p3 = scmp.ne.s32.totalorder %s2164_s10, %s2160_s9  ;;  %p42_p4 = scmp.eq.s32.totalorder %s2230_s13, 0 }
   0xc   : > { %s2246_s18 = scalar_select %p26_p1, %s2168_s11, %s28_s16  }
   0xd   : > { %p37_p5 = por %p36_p2, %p35_p0  ;;  %p2248_p6 = por %p42_p4, %p41_p3 }
   0xe   : > { %p91_p7 = scmp.eq.s32.totalorder %s2230_s13, 3  ;;  %p97_p8 = scmp.eq.s32.totalorder %s1817_s14, 3 }
   0xf   : > { %s2545_s19 = scalar_select %p2248_p6, 1, 0 }
  0x10   : > { %p1990_p9 = scmp.lt.s32.totalorder %s2172_s12, 4  ;;  %p2254_p10 = por %p91_p7, %p35_p0 }
  0x11   : > { %p2258_p11 = por %p97_p8, %p41_p3  ;;  %s2263_s22 = sand.u32 1, %s2168_s11  }
  0x12   : > { %s2546_s20 = scalar_select %p2254_p10, 1, 0 }
  0x13   : > { %s2547_s21 = scalar_select %p2258_p11, 1, 0 }
  0x14   : > { %s1969_s23 = smul.u32 192, %s2172_s12  ;;  %p2272_p12 = pnand %p1990_p9, %p37_p5 }
  0x15   : > { %s1968_s24 = smul.u32 12, %s2263_s22  ;;  %s118_s3 = scalar_lea.sflag [#allocation3], %s2263_s22 }
  0x16   : > { %s2270_s27 = scalar_lea.hbm %s2540_s0, %s1969_s23  ;;  %p2044_p2 = pneg %p2272_p12 }
  0x17   : > { %s121_s29 = scalar_lea.vmem [#allocation2], %s1968_s24  ;;  %s2042_s4 = scalar_lea.hbm %s2270_s27, 192 }
  0x18   : > { %s129_s30 = sshll.u32 %s121_s29, 4  ;;  %p2043_p1 = scmp.ne.s32.totalorder %s2270_s27, %s2042_s4  ;;  %s2277_s30 = int_to_ptr.vmem [resolvable:$true] %s129_s30 }
  0x19   : > { %s2047_s7 = scalar_lea.hbm %s2540_s0, 768  ;;  %p2048_p5 = scmp.lt.u32.totalorder %s2270_s27, %s2540_s0 }
  0x1a   : > { %p2045_p3 = pnand %p2044_p2, %p2043_p1  ;;  %p2049_p7 = scmp.lt.u32.totalorder %s2047_s7, %s2042_s4 }
  0x1b   : > { %p2051_p9 = scmp.lt.u32.totalorder %s2042_s4, %s2270_s27 }
  0x1c   : > { %p2046_p4 = pneg %p2045_p3  ;;  %p2050_p8 = por %p2049_p7, %p2048_p5 }
  0x1e   : > { %p2052_p13 = por %p2051_p9, %p2050_p8 }
  0x20   : > { %p2053_p0 = pnand %p2052_p13, %p2046_p4 }
  0x22   : > { %2056 = shalt.err (!%p2053_p0)
}
  0x23   : > { %s2057_s16 = scalar_lea.vmem %s2277_s30, 192  ;;  %s2174_s17 = smov [#allocation2]  }
  0x24   : > { %p2058_p1 = scmp.ne.s32.totalorder %s2277_s30, %s2057_s16  ;;  %s2062_s23 = sshll.u32 %s2174_s17, 4  ;;  %s2063_s23 = int_to_ptr.vmem [resolvable:$false] %s2062_s23 }
  0x25   : > { %s2064_s24 = scalar_lea.vmem %s2063_s23, 384  ;;  %p2065_p10 = scmp.lt.s32.totalorder %s2277_s30, %s2063_s23 }
  0x26   : > { %p2060_p3 = pnand %p2058_p1, %p2044_p2  ;;  %p2066_p5 = scmp.lt.s32.totalorder %s2064_s24, %s2057_s16 }
  0x28   : > { %p2061_p11 = pneg %p2060_p3  ;;  %p2067_p7 = por %p2066_p5, %p2065_p10 }
  0x2a   : > { %p2068_p8 = pnand %p2067_p7, %p2061_p11 }
  0x2c   : > { %2071 = shalt.err (!%p2068_p8)
}
  0x2d   : > { %1982 = dma.hbm_to_vmem [thread:$0]  (!%p2272_p12), %s2270_s27, 192, %s2277_s30, %s118_s3  }
  0x2e   : > { %p2549_p13 = scmp.lt.s32.totalorder %s2172_s12, 5  ;;  %p2550_p0 = scmp.ge.s32.totalorder %s2172_s12, 1 }
  0x2f   : > { %s1821_s26 = sshll.u32 %s2263_s22, 3  ;;  %s1822_s29 = sshll.u32 %s2172_s12, 7 }
  0x30   : > { %p2310_p4 = pnand %p2550_p0, %p2549_p13  ;;  %s2319_s6 = scalar_lea.hbm %s2541_s1, %s1822_s29 }
  0x31   : > { %s140_s7 = scalar_lea.vmem [#allocation5], %s1821_s26  ;;  %s137_s27 = scalar_lea.sflag [#allocation6], %s2263_s22 }
  0x32   : > { %s2551_s25 = scalar_select %p2310_p4, 1, 0 }
  0x33   : > { %s147_s8 = sshll.u32 %s140_s7, 4  ;;  %s2072_s30 = scalar_lea.hbm %s2319_s6, 128  ;;  %s148_s8 = int_to_ptr.vmem [resolvable:$true] %s147_s8 }
  0x34   : > { %p2073_p10 = scmp.ne.s32.totalorder %s2319_s6, %s2072_s30  ;;  %s2077_s16 = scalar_lea.hbm %s2541_s1, 512 }
  0x35   : > { %p2078_p1 = scmp.lt.u32.totalorder %s2319_s6, %s2541_s1  ;;  %p2079_p3 = scmp.lt.u32.totalorder %s2077_s16, %s2072_s30 }
  0x36   : > { %p2075_p11 = pnand %p2073_p10, %p2044_p2  ;;  %p2081_p7 = scmp.lt.u32.totalorder %s2072_s30, %s2319_s6 }
  0x37   : > { %p2080_p5 = por %p2079_p3, %p2078_p1 }
  0x38   : > { %p2076_p9 = pneg %p2075_p11 }
  0x39   : > { %p2082_p8 = por %p2081_p7, %p2080_p5 }
  0x3b   : > { %p2083_p13 = pnand %p2082_p8, %p2076_p9 }
  0x3d   : > { %2086 = shalt.err (!%p2083_p13)
}
  0x3e   : > { %s2087_s22 = scalar_lea.vmem %s148_s8, 128  ;;  %s2175_s24 = smov [#allocation5]  }
  0x3f   : > { %p2088_p0 = scmp.ne.s32.totalorder %s148_s8, %s2087_s22  ;;  %s2092_s26 = sshll.u32 %s2175_s24, 4  ;;  %s2093_s26 = int_to_ptr.vmem [resolvable:$false] %s2092_s26 }
  0x40   : > { %s2094_s29 = scalar_lea.vmem %s2093_s26, 256  ;;  %p2095_p6 = scmp.lt.s32.totalorder %s148_s8, %s2093_s26 }
  0x41   : > { %p2090_p10 = pnand %p2088_p0, %p2044_p2  ;;  %p2096_p4 = scmp.lt.s32.totalorder %s2094_s29, %s2087_s22 }
  0x43   : > { %p2091_p11 = pneg %p2090_p10  ;;  %p2097_p1 = por %p2096_p4, %p2095_p6 }
  0x45   : > { %p2098_p3 = pnand %p2097_p1, %p2091_p11 }
  0x47   : > { %2101 = shalt.err (!%p2098_p3)
}
  0x48   : > { %1985 = dma.hbm_to_vmem [thread:$0]  (!%p2272_p12), %s2319_s6, 128, %s148_s8, %s137_s27  }
  0x49   : > { %p2552_p9 = scmp.ne.s32.totalorder %s2551_s25, 0 }
  0x4a   : > { %s2344_s4 = sand.u32 (!%p2552_p9), 1, %s2164_s10   ;;  %p2553_p6 = scmp.ne.s32.totalorder (!%p2552_p9), %s2545_s19, 0 }
  0x4b   : > { %156 = sbr.rel (%p2552_p9) target bundleno = 502 (0x1f6), region = 28  ;;  %s159_s7 = scalar_lea.sflag (!%p2552_p9), [#allocation3], %s2344_s4 }
  0x4c   : > { %s1970_s5 = smul.u32 (!%p2552_p9), 12, %s2344_s4 }
  0x4e   : > { %s2348_s30 = scalar_lea.vmem (!%p2552_p9), [#allocation2], %s1970_s5 }
  0x52   : > { %2147 = dma.done.wait (%p2553_p6), %s159_s7, 192  }
  0x53   : > { %2149 = vsyncadd (%p2553_p6), %s159_s7, 4294967104  ;;  %s1824_s28 = sshll.u32 %s2344_s4, 3  ;;  %s168_s25 = scalar_lea.sflag [#allocation6], %s2344_s4 }
  0x54   : > { %s171_s6 = scalar_lea.vmem [#allocation5], %s1824_s28 }
  0x55   : > { %2151 = dma.done.wait (%p2553_p6), %s168_s25, 128  }
  0x56   : > { %2153 = vsyncadd (%p2553_p6), %s168_s25, 4294967168  ;;  %v2176_v0 = vmov 0.0   ;;  %vm2177_vm0 = vmmov 0   ;;  %v2365_v1 = vld [vmem:[%s2348_s30] sm:$0xff]  ;;  %s2178_s8 = smov 127   ;;  %v2372_v3 = vld [vmem:[%s171_s6] sm:$0xff] }
  0x57   : > { %1891 = vmatprep.subr.mxu1 %v2176_v0  ;;  %1893 = vmatprep.mubr.msk.f32.mxu1 %vm2177_vm0, %v2176_v0  ;;  %v2370_v2 = vcombine.high %v2365_v1, %v2365_v1  ;;  %v2376_v4 = vld [vmem:[%s2348_s30 + $0x8] sm:$0xf]  ;;  %s2179_s19 = smov 124   ;;  %s2180_s27 = smov 126   ;;  %vm218_vm1 = vcmask 1043456   ;;  %vm212_vm2 = vcmask 1039360  }
  0x58   : > { %289 = vmatprep.mubr.f32.mxu0 %v2176_v0  ;;  %206 = vrot.lane.b32.xlu1 %v2365_v1, %s2178_s8  ;;  %v516_v5 = vld [vmem:[%s2348_s30 + $0x8] sm:$0xf]  ;;  %s2181_s3 = smov 120   ;;  %s2182_s14 = smov 110   ;;  %vm215_vm3 = vcmask 31744   ;;  %vm530_vm4 = vcmask 1031168  }
  0x59   : > { %208 = vrot.lane.b32.xlu0 %v2370_v2, %s2178_s8  ;;  %v686_v6 = vld [vmem:[%s2348_s30 + $0x8] sm:$0xf]  ;;  %s2183_s16 = smov 116   ;;  %s2184_s17 = smov 109   ;;  %vm700_vm5 = vcmask 900096   ;;  %vm870_vm6 = vcmask 891904  }
  0x5a   : > { %v856_v7 = vld [vmem:[%s2348_s30 + $0x8] sm:$0xf]  ;;  %s2185_s23 = smov 112   ;;  %s2186_s22 = smov 108   ;;  %vm1040_vm7 = vcmask 883712   ;;  %vm1210_vm8 = vcmask 752640  }
  0x5b   : > { %v1026_v8 = vld [vmem:[%s2348_s30 + $0x8] sm:$0xf]  ;;  %s2187_s24 = smov 92   ;;  %s2188_s26 = smov 104   ;;  %vm1380_vm9 = vcmask 744448   ;;  %vm1550_vm10 = vcmask 736256  }
  0x5c   : > { %201 = vrot.lane.b32.xlu1 %v2372_v3, %s2179_s19  ;;  %v1196_v9 = vld [vmem:[%s2348_s30 + $0x8] sm:$0xf]  ;;  %s2189_s29 = smov 91   ;;  %s2190_s5 = smov 100   ;;  %vm1707_vm11 = vcmask 261120  }
  0x5d   : > { %210 = vrot.lane.b32.xlu0 %v2376_v4, %s2178_s8  ;;  %v1366_v10 = vld [vmem:[%s2348_s30 + $0x8] sm:$0xf]  ;;  %s2191_s7 = smov 90   ;;  %s2192_s28 = smov 96  }
  0x5e   : > { %v1536_v11 = vld [vmem:[%s2348_s30 + $0x8] sm:$0xf]  ;;  %s1971_s30 = smul.u32 24, %s2344_s4  ;;  %p2554_p2 = scmp.ne.s32.totalorder %s2546_s20, 0 }
  0x5f   : > { %s1972_s25 = smul.u32 384, %s2230_s13  ;;  %s1710_s13 = scalar_lea.sflag [#allocation4], %s2344_s4 }
  0x60   : > { %528 = vrot.lane.b32.xlu1 %v516_v5, %s2180_s27  ;;  %s196_s6 = scalar_lea.vmem [#allocation7], %s1971_s30 }
  0x61   : > { %526 = vrot.lane.b32.xlu0 %v2370_v2, %s2180_s27  ;;  %s1724_s8 = sshll.u32 %s196_s6, 4  ;;  %s2499_s8 = int_to_ptr.vmem [resolvable:$true] %s1724_s8 }
  0x64   : > { %519 = vrot.lane.b32.xlu1 %v2372_v3, %s2181_s3  ;;  %s2497_s3 = scalar_lea.hbm %s2542_s2, %s1972_s25 }
  0x65   : > { %524 = vrot.lane.b32.xlu0 %v2365_v1, %s2180_s27 }
  0x68   : > { %698 = vrot.lane.b32.xlu1 %v686_v6, %s2182_s14 }
  0x69   : > { %696 = vrot.lane.b32.xlu0 %v2370_v2, %s2182_s14 }
  0x6c   : > { %689 = vrot.lane.b32.xlu1 %v2372_v3, %s2183_s16  ;;  %s2193_s16 = smov [#allocation7]  }
  0x6d   : > { %694 = vrot.lane.b32.xlu0 %v2365_v1, %s2182_s14  ;;  %s2102_s14 = scalar_lea.vmem %s2499_s8, 384 }
  0x6e   : > { %p2103_p12 = scmp.ne.s32.totalorder %s2499_s8, %s2102_s14 }
  0x70   : > { %868 = vrot.lane.b32.xlu1 %v856_v7, %s2184_s17  ;;  %p2104_p4 = pnand %p2103_p12, %p2554_p2 }
  0x71   : > { %866 = vrot.lane.b32.xlu0 %v2370_v2, %s2184_s17 }
  0x72   : > { %p2105_p5 = pneg %p2104_p4 }
  0x74   : > { %859 = vrot.lane.b32.xlu1 %v2372_v3, %s2185_s23 }
  0x75   : > { %864 = vrot.lane.b32.xlu0 %v2365_v1, %s2184_s17  ;;  %s2106_s17 = sshll.u32 %s2193_s16, 4  ;;  %s2107_s17 = int_to_ptr.vmem [resolvable:$false] %s2106_s17 }
  0x76   : > { %s2108_s23 = scalar_lea.vmem %s2107_s17, 768  ;;  %p2109_p7 = scmp.lt.s32.totalorder %s2499_s8, %s2107_s17 }
  0x77   : > { %p2110_p8 = scmp.lt.s32.totalorder %s2108_s23, %s2102_s14 }
  0x78   : > { %1038 = vrot.lane.b32.xlu1 %v1026_v8, %s2186_s22 }
  0x79   : > { %1036 = vrot.lane.b32.xlu0 %v2370_v2, %s2186_s22  ;;  %p2111_p13 = por %p2110_p8, %p2109_p7 }
  0x7b   : > { %p2112_p0 = pnand %p2111_p13, %p2105_p5 }
  0x7c   : > { %1029 = vrot.lane.b32.xlu1 %v2372_v3, %s2186_s22 }
  0x7d   : > { %1034 = vrot.lane.b32.xlu0 %v2365_v1, %s2186_s22 }
  0x80   : > { %1208 = vrot.lane.b32.xlu1 %v1196_v9, %s2187_s24 }
  0x81   : > { %1206 = vrot.lane.b32.xlu0 %v2370_v2, %s2187_s24 }
  0x84   : > { %1199 = vrot.lane.b32.xlu1 %v2372_v3, %s2188_s26 }
  0x85   : > { %1204 = vrot.lane.b32.xlu0 %v2365_v1, %s2187_s24 }
  0x88   : > { %1378 = vrot.lane.b32.xlu1 %v1366_v10, %s2189_s29 }
  0x89   : > { %1376 = vrot.lane.b32.xlu0 %v2370_v2, %s2189_s29 }
  0x8c   : > { %1369 = vrot.lane.b32.xlu1 %v2372_v3, %s2190_s5 }
  0x8d   : > { %1374 = vrot.lane.b32.xlu0 %v2365_v1, %s2189_s29 }
  0x90   : > { %1548 = vrot.lane.b32.xlu1 %v1536_v11, %s2191_s7 }
  0x91   : > { %1546 = vrot.lane.b32.xlu0 %v2370_v2, %s2191_s7 }
  0x94   : > { %1539 = vrot.lane.b32.xlu1 %v2372_v3, %s2192_s28 }
  0x95   : > { %1544 = vrot.lane.b32.xlu0 %v2365_v1, %s2191_s7 }
  0xca   : > { %v207_v12 = vpop.permute.xlu1 %206 }
  0xcb   : > { %v209_v13 = vpop.permute.xlu0 %208 }
  0xcc   : > { %v213_v17 = vsel %vm212_vm2, %v207_v12, %v209_v13 }
  0xce   : > { %v202_v14 = vpop.permute.xlu1 %201 }
  0xcf   : > { %v211_v15 = vpop.permute.xlu0 %210 }
  0xd0   : > { %1892 = vmatpush3.msk.msra.mxu1 %vm218_vm1, %v211_v15  ;;  %v214_v16 = vsel %vm212_vm2, %v209_v13, %v211_v15 }
  0xd1   : > { %1825 = vmatprep.subr.msk.mxu0 %vm218_vm1, %v214_v16  ;;  %1894 = vmatmul.mubr.msk.f32.vlgmr.msra.gmra.mrb[0].mxu1 %vm215_vm3, %v202_v14 }
  0xd2   : > { %v529_v18 = vpop.permute.xlu1 %528  ;;  %1826 = vmatpush1.msk.msra.mxu0 %vm218_vm1, %v213_v17  ;;  %1896 = vmatprep.subr.mxu1 %v2176_v0 }
  0xd3   : > { %1827 = vmatmul.mubr.msk.f32.vlgmr.msra.gmra.mrb[0].mxu0 %vm215_vm3, %v202_v14  ;;  %1830 = vmatprep.subr.msk.mxu0 %vm218_vm1, %v2370_v2  ;;  %v527_v19 = vpop.permute.xlu0 %526 }
  0xd4   : > { %1831 = vmatpush1.msk.msra.mxu0 %vm218_vm1, %v2365_v1  ;;  %1897 = vmatpush3.msk.msra.mxu1 %vm218_vm1, %v2376_v4  ;;  %v532_v20 = vsel %vm530_vm4, %v527_v19, %v529_v18 }
  0xd5   : > { %1898 = vmatprep.mubr.msk.f32.mxu1 %vm2177_vm0, %v2176_v0  ;;  %1835 = vmatprep.subr.msk.mxu0 %vm218_vm1, %v532_v20 }
  0xd6   : > { %v520_v21 = vpop.permute.xlu1 %519  ;;  %1901 = vmatprep.subr.mxu1 %v2176_v0  ;;  %438 = vmatprep.mubr.f32.mxu0 %v2176_v0 }
  0xd7   : > { %v525_v22 = vpop.permute.xlu0 %524 }
  0xd8   : > { %v531_v23 = vsel %vm530_vm4, %v525_v22, %v527_v19 }
  0xd9   : > { %1899 = vmatmul.mubr.msk.f32.vlgmr.msra.gmra.mrb[0].mxu1 %vm215_vm3, %v2372_v3 }
  0xda   : > { %v699_v24 = vpop.permute.xlu1 %698  ;;  %1902 = vmatpush3.msk.msra.mxu1 %vm218_vm1, %v529_v18  ;;  %1903 = vmatprep.mubr.msk.f32.mxu1 %vm2177_vm0, %v2176_v0 }
  0xdb   : > { %1832 = vmatmul.mubr.msk.f32.vlgmr.msra.gmra.mrb[0].mxu0 %vm215_vm3, %v2372_v3  ;;  %v697_v25 = vpop.permute.xlu0 %696  ;;  %1906 = vmatprep.subr.mxu1 %v2176_v0 }
  0xdc   : > { %1836 = vmatpush1.msk.msra.mxu0 %vm218_vm1, %v531_v23  ;;  %v702_v26 = vsel %vm700_vm5, %v697_v25, %v699_v24  ;;  %605 = vmatprep.mubr.f32.mxu0 %v2176_v0 }
  0xdd   : > { %1840 = vmatprep.subr.msk.mxu0 %vm218_vm1, %v702_v26 }
  0xde   : > { %v690_v27 = vpop.permute.xlu1 %689 }
  0xdf   : > { %v695_v28 = vpop.permute.xlu0 %694 }
  0xe0   : > { %v701_v29 = vsel %vm700_vm5, %v695_v28, %v697_v25 }
  0xe1   : > { %1904 = vmatmul.mubr.msk.f32.vlgmr.msra.gmra.mrb[0].mxu1 %vm215_vm3, %v520_v21 }
  0xe2   : > { %v869_v30 = vpop.permute.xlu1 %868  ;;  %1907 = vmatpush3.msk.msra.mxu1 %vm218_vm1, %v699_v24  ;;  %1908 = vmatprep.mubr.msk.f32.mxu1 %vm2177_vm0, %v2176_v0 }
  0xe3   : > { %1837 = vmatmul.mubr.msk.f32.vlgmr.msra.gmra.mrb[0].mxu0 %vm215_vm3, %v520_v21  ;;  %v867_v31 = vpop.permute.xlu0 %866  ;;  %1911 = vmatprep.subr.mxu1 %v2176_v0 }
  0xe4   : > { %1841 = vmatpush1.msk.msra.mxu0 %vm218_vm1, %v701_v29  ;;  %v872_v32 = vsel %vm870_vm6, %v867_v31, %v869_v30  ;;  %775 = vmatprep.mubr.f32.mxu0 %v2176_v0 }
  0xe5   : > { %1845 = vmatprep.subr.msk.mxu0 %vm218_vm1, %v872_v32 }
  0xe6   : > { %v860_v33 = vpop.permute.xlu1 %859 }
  0xe7   : > { %v865_v34 = vpop.permute.xlu0 %864 }
  0xe8   : > { %v871_v35 = vsel %vm870_vm6, %v865_v34, %v867_v31 }
  0xe9   : > { %1909 = vmatmul.mubr.msk.f32.vlgmr.msra.gmra.mrb[0].mxu1 %vm215_vm3, %v690_v27 }
  0xea   : > { %v1039_v36 = vpop.permute.xlu1 %1038  ;;  %1912 = vmatpush3.msk.msra.mxu1 %vm218_vm1, %v869_v30  ;;  %1913 = vmatprep.mubr.msk.f32.mxu1 %vm2177_vm0, %v2176_v0 }
  0xeb   : > { %1842 = vmatmul.mubr.msk.f32.vlgmr.msra.gmra.mrb[0].mxu0 %vm215_vm3, %v690_v27  ;;  %v1037_v37 = vpop.permute.xlu0 %1036  ;;  %1916 = vmatprep.subr.mxu1 %v2176_v0 }
  0xec   : > { %1846 = vmatpush1.msk.msra.mxu0 %vm218_vm1, %v871_v35  ;;  %v1042_v38 = vsel %vm1040_vm7, %v1037_v37, %v1039_v36  ;;  %945 = vmatprep.mubr.f32.mxu0 %v2176_v0 }
  0xed   : > { %1850 = vmatprep.subr.msk.mxu0 %vm218_vm1, %v1042_v38 }
  0xee   : > { %v1030_v39 = vpop.permute.xlu1 %1029 }
  0xef   : > { %v1035_v40 = vpop.permute.xlu0 %1034 }
  0xf0   : > { %v1041_v41 = vsel %vm1040_vm7, %v1035_v40, %v1037_v37 }
  0xf1   : > { %1914 = vmatmul.mubr.msk.f32.vlgmr.msra.gmra.mrb[0].mxu1 %vm215_vm3, %v860_v33 }
  0xf2   : > { %v1209_v42 = vpop.permute.xlu1 %1208  ;;  %1917 = vmatpush3.msk.msra.mxu1 %vm218_vm1, %v1039_v36  ;;  %1918 = vmatprep.mubr.msk.f32.mxu1 %vm2177_vm0, %v2176_v0 }
  0xf3   : > { %1847 = vmatmul.mubr.msk.f32.vlgmr.msra.gmra.mrb[0].mxu0 %vm215_vm3, %v860_v33  ;;  %v1207_v43 = vpop.permute.xlu0 %1206  ;;  %1921 = vmatprep.subr.mxu1 %v2176_v0 }
  0xf4   : > { %1851 = vmatpush1.msk.msra.mxu0 %vm218_vm1, %v1041_v41  ;;  %v1212_v44 = vsel %vm1210_vm8, %v1207_v43, %v1209_v42  ;;  %1115 = vmatprep.mubr.f32.mxu0 %v2176_v0 }
  0xf5   : > { %1855 = vmatprep.subr.msk.mxu0 %vm218_vm1, %v1212_v44 }
  0xf6   : > { %v1200_v45 = vpop.permute.xlu1 %1199 }
  0xf7   : > { %v1205_v46 = vpop.permute.xlu0 %1204 }
  0xf8   : > { %v1211_v47 = vsel %vm1210_vm8, %v1205_v46, %v1207_v43 }
  0xf9   : > { %1919 = vmatmul.mubr.msk.f32.vlgmr.msra.gmra.mrb[0].mxu1 %vm215_vm3, %v1030_v39 }
  0xfa   : > { %v1379_v48 = vpop.permute.xlu1 %1378  ;;  %1922 = vmatpush3.msk.msra.mxu1 %vm218_vm1, %v1209_v42  ;;  %1923 = vmatprep.mubr.msk.f32.mxu1 %vm2177_vm0, %v2176_v0 }
  0xfb   : > { %1852 = vmatmul.mubr.msk.f32.vlgmr.msra.gmra.mrb[0].mxu0 %vm215_vm3, %v1030_v39  ;;  %v1377_v49 = vpop.permute.xlu0 %1376  ;;  %1926 = vmatprep.subr.mxu1 %v2176_v0 }
  0xfc   : > { %1856 = vmatpush1.msk.msra.mxu0 %vm218_vm1, %v1211_v47  ;;  %v1382_v50 = vsel %vm1380_vm9, %v1377_v49, %v1379_v48  ;;  %1285 = vmatprep.mubr.f32.mxu0 %v2176_v0 }
  0xfd   : > { %1860 = vmatprep.subr.msk.mxu0 %vm218_vm1, %v1382_v50 }
  0xfe   : > { %v1370_v51 = vpop.permute.xlu1 %1369 }
  0xff   : > { %v1375_v52 = vpop.permute.xlu0 %1374 }
 0x100   : > { %v1381_v53 = vsel %vm1380_vm9, %v1375_v52, %v1377_v49 }
 0x101   : > { %1924 = vmatmul.mubr.msk.f32.vlgmr.msra.gmra.mrb[0].mxu1 %vm215_vm3, %v1200_v45 }
 0x102   : > { %v1549_v54 = vpop.permute.xlu1 %1548  ;;  %1927 = vmatpush3.msk.msra.mxu1 %vm218_vm1, %v1379_v48  ;;  %1928 = vmatprep.mubr.msk.f32.mxu1 %vm2177_vm0, %v2176_v0 }
 0x103   : > { %1857 = vmatmul.mubr.msk.f32.vlgmr.msra.gmra.mrb[0].mxu0 %vm215_vm3, %v1200_v45  ;;  %v1547_v55 = vpop.permute.xlu0 %1546  ;;  %1931 = vmatprep.subr.mxu1 %v2176_v0 }
 0x104   : > { %1861 = vmatpush1.msk.msra.mxu0 %vm218_vm1, %v1381_v53  ;;  %v1552_v56 = vsel %vm1550_vm10, %v1547_v55, %v1549_v54  ;;  %1455 = vmatprep.mubr.f32.mxu0 %v2176_v0 }
 0x105   : > { %1865 = vmatprep.subr.msk.mxu0 %vm218_vm1, %v1552_v56 }
 0x106   : > { %v1540_v59 = vpop.permute.xlu1 %1539 }
 0x107   : > { %v1545_v57 = vpop.permute.xlu0 %1544 }
 0x108   : > { %v1551_v58 = vsel %vm1550_vm10, %v1545_v57, %v1547_v55 }
 0x109   : > { %1929 = vmatmul.mubr.msk.f32.vlgmr.msra.gmra.mrb[0].mxu1 %vm215_vm3, %v1370_v51 }
 0x10a   : > { %1932 = vmatpush3.msk.msra.mxu1 %vm218_vm1, %v1549_v54  ;;  %1933 = vmatprep.mubr.msk.f32.mxu1 %vm2177_vm0, %v2176_v0 }
 0x10b   : > { %1862 = vmatmul.mubr.msk.f32.vlgmr.msra.gmra.mrb[0].mxu0 %vm215_vm3, %v1370_v51 }
 0x10c   : > { %1866 = vmatpush1.msk.msra.mxu0 %vm218_vm1, %v1551_v58  ;;  %1625 = vmatprep.mubr.f32.mxu0 %v2176_v0 }
 0x111   : > { %1934 = vmatmul.mubr.msk.f32.vlgmr.msra.gmra.mrb[0].mxu1 %vm215_vm3, %v1540_v59 }
 0x113   : > { %1867 = vmatmul.mubr.msk.f32.vlgmr.msra.gmra.mrb[0].mxu0 %vm215_vm3, %v1540_v59 }
 0x1e4   : > { %v1698_v60 = vpop.f32.mrb[0].mxu1 }
 0x1e5   : > { %1708 = vst.msk [vmem:[%s196_s6 + $0x10] sm:$0xff] %vm1707_vm11, %v1698_v60  ;;  %v1935_v61 = vpop.f32.mrb[1].mxu1 }
 0x1e6   : > { %v1627_v62 = vpop.f32.mrb[0].mxu0 }
 0x1e7   : > { %1705 = vst [vmem:[%s196_s6] sm:$0xff] %v1627_v62  ;;  %v1629_v63 = vpop.f32.mrb[1].mxu0 }
 0x1e8   : > { %1706 = vst [vmem:[%s196_s6 + $0x8] sm:$0xff] %v1629_v63 }
 0x1e9   : > { %2115 = shalt.err (!%p2112_p0)
}
 0x1ea   : > { %s2116_s4 = scalar_lea.hbm %s2497_s3, 384  ;;  %s2120_s26 = scalar_lea.hbm %s2542_s2, 1536 }
 0x1eb   : > { %p2117_p10 = scmp.ne.s32.totalorder %s2497_s3, %s2116_s4  ;;  %p2121_p3 = scmp.lt.u32.totalorder %s2497_s3, %s2542_s2 }
 0x1ec   : > { %p2122_p9 = scmp.lt.u32.totalorder %s2120_s26, %s2116_s4  ;;  %p2124_p12 = scmp.lt.u32.totalorder %s2116_s4, %s2497_s3 }
 0x1ed   : > { %p2118_p11 = pnand %p2117_p10, %p2554_p2 }
 0x1ee   : > { %p2123_p6 = por %p2122_p9, %p2121_p3 }
 0x1ef   : > { %p2119_p1 = pneg %p2118_p11 }
 0x1f0   : > { %p2125_p4 = por %p2124_p12, %p2123_p6 }
 0x1f2   : > { %p2126_p5 = pnand %p2125_p4, %p2119_p1 }
 0x1f4   : > { %2129 = shalt.err (!%p2126_p5)
}
 0x1f5   : > { %1977 = dma.vmem_to_hbm [thread:$0]  (%p2554_p2), %s2499_s8, 384, %s2497_s3, %s1710_s13  }
 0x1f6 PF: > { %p1991_p7 = scmp.ge.s32.totalorder %s2172_s12, 2  ;;  %s1736_s7 = sand.u32 1, %s2160_s9  }
 0x1f7   : > { %p2555_p8 = scmp.ne.s32.totalorder %s2547_s21, 0  ;;  %s1737_s28 = scalar_lea.sflag [#allocation4], %s1736_s7 }
 0x1f9   : > { %p1987_p13 = pnand %p1991_p7, %p2555_p8 }
 0x1fb   : > { %2155 = dma.done.wait (!%p1987_p13), %s1737_s28, 384  }
 0x1fc   : > { %2157 = vsyncadd (!%p1987_p13), %s1737_s28, 4294966912  ;;  %p18_p0 = scmp.ge.s32.totalorder %s2234_s15, 6   ;;  %s2556_s9 = smov %s2164_s10 }
 0x1fd   : > { %s2557_s10 = smov %s2168_s11  ;;  %s2558_s11 = smov %s2246_s18 }
 0x1fe   : > { %s2559_s12 = smov %s2234_s15  ;;  %20 = sbr.rel (!%p18_p0) target bundleno = 7 (0x7), region = 86 }
 0x205   :  { %1742 = vsyncpa [#allocation3], 1 }
 0x206   :  { %1744 = vsyncpa [#allocation3 + $0x1], 1 }
 0x207   :  { %1745 = vsyncpa [#allocation6], 1 }
 0x208   :  { %1747 = vsyncpa [#allocation6 + $0x1], 1 }
 0x209   :  { %1748 = vsyncpa [#allocation4], 1 }
 0x20a   :  { %1750 = vsyncpa [#allocation4 + $0x1], 1 }

</bundles_post_ra>
